<compile_context>
chip_gen: v5e
topology: v5e:2x2
jax: 0.10.0
libtpu: 0.0.40
codegen_flags: <defaults>
</compile_context>

<pallas_src>
import functools

import jax
import jax.numpy as jnp
from jax.experimental import pallas as pl
from jax.experimental.pallas import tpu as pltpu

# ---- static model config (synthetic, deterministic init) -------------------
IN_FEATURES = 32       # logical in_features
OUT_FEATURES = 8       # logical out_features
HIDDEN = 64            # fixed by the module: Linear(in_features, 64)
N_RES_BLOCK = 2
BATCH = 64             # small example batch

LANE = 128             # TPU lane width: every padded feature dim is 128
TM_MAX = 1024          # max batch rows per grid step (per-core tile cap)


# ---------------------------------------------------------------------------
# Kernel
# ---------------------------------------------------------------------------
def _resnet_dnn_kernel(n_res_block,
                       x_ref,                              # (TM, 128) f32
                       w1_ref, b1_ref, w2_ref, b2_ref,     # stacked residual-block params
                       w3_ref, b3_ref,                     # Linear(F, 64)   padded to (128, 128)
                       w4_ref, b4_ref,                     # Linear(64, out) padded to (128, 128)
                       out_ref):                           # (TM, 128) bf16
    # Activations / adds stay f32 (no bf16 VPU dependence on v5e); matmul
    # operands are cast to bf16 (MXU bf16 path) with f32 accumulation.
    h = x_ref[...]

    # Residual blocks: relu( fc2(relu(fc1(x))) + x )
    for i in range(n_res_block):            # small static loop, unrolled
        y = jnp.dot(h.astype(jnp.bfloat16), w1_ref[i],
                    preferred_element_type=jnp.float32) + b1_ref[i]
        y = jnp.maximum(y, 0.0)
        y = jnp.dot(y.astype(jnp.bfloat16), w2_ref[i],
                    preferred_element_type=jnp.float32) + b2_ref[i]
        h = jnp.maximum(y + h, 0.0)

    # Linear(F, 64) + ReLU (padded lanes remain exactly zero)
    y = jnp.dot(h.astype(jnp.bfloat16), w3_ref[...],
                preferred_element_type=jnp.float32) + b3_ref[...]
    y = jnp.maximum(y, 0.0)

    # Linear(64, out_features) -> lane-dense (TM, 128) bf16 store
    out = jnp.dot(y.astype(jnp.bfloat16), w4_ref[...],
                  preferred_element_type=jnp.float32) + b4_ref[...]
    out_ref[...] = out.astype(out_ref.dtype)


# ---------------------------------------------------------------------------
# Parameter packing (done ONCE, outside the per-call jit)
# ---------------------------------------------------------------------------
def _pad_last2(a, rows, cols, dtype):
    """Zero-pad the last two dims of `a` to (rows, cols) and cast."""
    out = jnp.zeros(a.shape[:-2] + (rows, cols), dtype)
    return out.at[..., : a.shape[-2], : a.shape[-1]].set(a.astype(dtype))


def pack_params(params):
    """Pad all feature dims to 128 lanes; weights -> bf16, biases -> f32.

    NOTE: correctness of the 128-lane padding relies on BOTH weights and
    biases being zero-padded (padded lanes stay exactly 0 through every
    relu / residual add). Any future lane-mixing op (layernorm, softmax,
    non-zero bias padding) would break this invariant.
    """
    return {
        "w1": _pad_last2(params["w1"], LANE, LANE, jnp.bfloat16),
        "b1": _pad_last2(params["b1"], 1, LANE, jnp.float32),
        "w2": _pad_last2(params["w2"], LANE, LANE, jnp.bfloat16),
        "b2": _pad_last2(params["b2"], 1, LANE, jnp.float32),
        "w3": _pad_last2(params["w3"], LANE, LANE, jnp.bfloat16),
        "b3": _pad_last2(params["b3"], 1, LANE, jnp.float32),
        "w4": _pad_last2(params["w4"], LANE, LANE, jnp.bfloat16),
        "b4": _pad_last2(params["b4"], 1, LANE, jnp.float32),
    }


# ---------------------------------------------------------------------------
# Wrapper
# ---------------------------------------------------------------------------
def _resident_spec(shape):
    """Full-array block with constant index_map -> VMEM-resident, DMA'd once."""
    nd = len(shape)
    return pl.BlockSpec(shape, lambda i, _nd=nd: (0,) * _nd)


def _num_tensorcores():
    """1 grid step per TensorCore: 2 on dual-TC v7x, else 1 (v5e/v6e/megacore)."""
    try:
        kind = jax.devices()[0].device_kind.lower()
    except Exception:  # pragma: no cover - defensive
        return 1
    return 2 if "v7" in kind else 1


def _forward_impl(x, packed, *, n_res_block, out_features):
    """x: [B, F] float32 (logical). Returns [B, out_features] float32."""
    B, F = x.shape
    n_tc = _num_tensorcores()

    # One big tile per core; only add grid steps beyond TM_MAX rows per step.
    n_steps = max(n_tc, -(-B // TM_MAX))
    n_steps = -(-n_steps // n_tc) * n_tc          # multiple of #cores
    row_quant = 8 * n_steps                       # tile rows must be /8
    b_pad = -(-B // row_quant) * row_quant
    tm = b_pad // n_steps

    # Pad batch rows and features to the 128-lane width; x stays f32 so the
    # residual skip connection uses full-precision inputs.
    x_pad = jnp.zeros((b_pad, LANE), jnp.float32).at[:B, :F].set(x)

    kernel = functools.partial(_resnet_dnn_kernel, n_res_block)

    out = pl.pallas_call(
        kernel,
        out_shape=jax.ShapeDtypeStruct((b_pad, LANE), jnp.bfloat16),
        grid=(n_steps,),
        in_specs=[
            pl.BlockSpec((tm, LANE), lambda i: (i, 0)),   # x: batch-tiled
            _resident_spec(packed["w1"].shape),
            _resident_spec(packed["b1"].shape),
            _resident_spec(packed["w2"].shape),
            _resident_spec(packed["b2"].shape),
            _resident_spec(packed["w3"].shape),
            _resident_spec(packed["b3"].shape),
            _resident_spec(packed["w4"].shape),
            _resident_spec(packed["b4"].shape),
        ],
        out_specs=pl.BlockSpec((tm, LANE), lambda i: (i, 0)),
        compiler_params=pltpu.CompilerParams(
            dimension_semantics=("parallel",),
        ),
    )(x_pad,
      packed["w1"], packed["b1"], packed["w2"], packed["b2"],
      packed["w3"], packed["b3"], packed["w4"], packed["b4"])

    return out[:B, :out_features].astype(jnp.float32)


def make_forward(n_res_block, out_features):
    """Jitted forward: (x, packed_params) -> [B, out_features] f32."""
    return jax.jit(functools.partial(
        _forward_impl, n_res_block=n_res_block, out_features=out_features))


# ---------------------------------------------------------------------------
# Synthetic parameters & pure-JAX reference
# ---------------------------------------------------------------------------
def init_params(key, in_features, out_features, n_res_block):
    """Deterministic synthetic parameters (logical sizes, f32, (in, out) layout)."""
    ks = jax.random.split(key, 8)
    scale = 0.1
    return {
        "w1": scale * jax.random.normal(ks[0], (n_res_block, in_features, in_features), jnp.float32),
        "b1": scale * jax.random.normal(ks[1], (n_res_block, 1, in_features), jnp.float32),
        "w2": scale * jax.random.normal(ks[2], (n_res_block, in_features, in_features), jnp.float32),
        "b2": scale * jax.random.normal(ks[3], (n_res_block, 1, in_features), jnp.float32),
        "w3": scale * jax.random.normal(ks[4], (in_features, HIDDEN), jnp.float32),
        "b3": scale * jax.random.normal(ks[5], (1, HIDDEN), jnp.float32),
        "w4": scale * jax.random.normal(ks[6], (HIDDEN, out_features), jnp.float32),
        "b4": scale * jax.random.normal(ks[7], (1, out_features), jnp.float32),
    }


def reference_forward(x, params, *, n_res_block):
    """Pure-JAX reference using the same bf16-operand / f32-accumulate math."""
    def mm(a, w):
        return jnp.dot(a.astype(jnp.bfloat16), w.astype(jnp.bfloat16),
                       preferred_element_type=jnp.float32)
    h = x.astype(jnp.float32)
    for i in range(n_res_block):
        y = jnp.maximum(mm(h, params["w1"][i]) + params["b1"][i], 0.0)
        y = mm(y, params["w2"][i]) + params["b2"][i]
        h = jnp.maximum(y + h, 0.0)
    y = jnp.maximum(mm(h, params["w3"]) + params["b3"], 0.0)
    return mm(y, params["w4"]) + params["b4"]


if __name__ == "__main__":
    key = jax.random.PRNGKey(0)
    kx, kp = jax.random.split(key)
    x = jax.random.normal(kx, (BATCH, IN_FEATURES), jnp.float32)
    params = init_params(kp, IN_FEATURES, OUT_FEATURES, N_RES_BLOCK)

    packed = pack_params(params)                       # pack weights ONCE
    forward = make_forward(N_RES_BLOCK, OUT_FEATURES)  # jitted pad+kernel+slice

    out = forward(x, packed)
    out = jax.block_until_ready(out)

    ref = reference_forward(x, params, n_res_block=N_RES_BLOCK)
    assert out.shape == (BATCH, OUT_FEATURES)
    # Tolerance covers bf16 MXU operands + bf16 output store (<=0.4% rel).
    assert jnp.allclose(out, ref, atol=3e-2, rtol=3e-2), "mismatch vs reference"

    print("KERNEL_OK")
</pallas_src>

<mosaic_0001>
module attributes {stable_mosaic.version = 11 : i64} {
  func.func @_resnet_dnn_kernel(%arg0: i32, %arg1: memref<64x128xf32, #tpu.memory_space<vmem>>, %arg2: memref<2x128x128xbf16, #tpu.memory_space<vmem>>, %arg3: memref<2x1x128xf32, #tpu.memory_space<vmem>>, %arg4: memref<2x128x128xbf16, #tpu.memory_space<vmem>>, %arg5: memref<2x1x128xf32, #tpu.memory_space<vmem>>, %arg6: memref<128x128xbf16, #tpu.memory_space<vmem>>, %arg7: memref<1x128xf32, #tpu.memory_space<vmem>>, %arg8: memref<128x128xbf16, #tpu.memory_space<vmem>>, %arg9: memref<1x128xf32, #tpu.memory_space<vmem>>, %arg10: memref<64x128xbf16, #tpu.memory_space<vmem>>) attributes {dimension_semantics = [#tpu.dimension_semantics<parallel>], iteration_bounds = array<i64: 1>, scalar_prefetch = 0 : i64, scratch_operands = 0 : i64, tpu.core_type = #tpu.core_type<tc>, window_params = [{transform_indices = @transform_0, window_bounds = array<i64: 64, 128>}, {pipeline_mode = #tpu.pipeline_mode<synchronous>, transform_indices = @transform_1, window_bounds = array<i64: 2, 128, 128>}, {pipeline_mode = #tpu.pipeline_mode<synchronous>, transform_indices = @transform_2, window_bounds = array<i64: 2, 1, 128>}, {pipeline_mode = #tpu.pipeline_mode<synchronous>, transform_indices = @transform_3, window_bounds = array<i64: 2, 128, 128>}, {pipeline_mode = #tpu.pipeline_mode<synchronous>, transform_indices = @transform_4, window_bounds = array<i64: 2, 1, 128>}, {pipeline_mode = #tpu.pipeline_mode<synchronous>, transform_indices = @transform_5, window_bounds = array<i64: 128, 128>}, {pipeline_mode = #tpu.pipeline_mode<synchronous>, transform_indices = @transform_6, window_bounds = array<i64: 1, 128>}, {pipeline_mode = #tpu.pipeline_mode<synchronous>, transform_indices = @transform_7, window_bounds = array<i64: 128, 128>}, {pipeline_mode = #tpu.pipeline_mode<synchronous>, transform_indices = @transform_8, window_bounds = array<i64: 1, 128>}, {transform_indices = @transform_9, window_bounds = array<i64: 64, 128>}]} {
    %c0 = arith.constant 0 : index
    %c0_0 = arith.constant 0 : index
    %0 = vector.load %arg1[%c0, %c0_0] : memref<64x128xf32, #tpu.memory_space<vmem>>, vector<64x128xf32>
    %1 = arith.truncf %0 : vector<64x128xf32> to vector<64x128xbf16>
    %c0_1 = arith.constant 0 : index
    %c0_2 = arith.constant 0 : index
    %c0_3 = arith.constant 0 : index
    %2 = vector.load %arg2[%c0_1, %c0_2, %c0_3] : memref<2x128x128xbf16, #tpu.memory_space<vmem>>, vector<1x128x128xbf16>
    %3 = vector.shape_cast %2 : vector<1x128x128xbf16> to vector<128x128xbf16>
    %cst = arith.constant dense<0.000000e+00> : vector<64x128xf32>
    %4 = tpu.matmul %1, %3, %cst {dimension_numbers = #tpu.dot_dimension_numbers<[1], [0], [0], [1], [0, 0, 1, 1], [], []>} : vector<64x128xbf16>, vector<128x128xbf16>, vector<64x128xf32> -> vector<64x128xf32>
    %c0_4 = arith.constant 0 : index
    %c0_5 = arith.constant 0 : index
    %c0_6 = arith.constant 0 : index
    %5 = vector.load %arg3[%c0_4, %c0_5, %c0_6] : memref<2x1x128xf32, #tpu.memory_space<vmem>>, vector<1x1x128xf32>
    %6 = vector.shape_cast %5 : vector<1x1x128xf32> to vector<1x128xf32>
    %7 = vector.broadcast %6 : vector<1x128xf32> to vector<64x128xf32>
    %8 = arith.addf %4, %7 : vector<64x128xf32>
    %cst_7 = arith.constant 0.000000e+00 : f32
    %9 = vector.broadcast %cst_7 : f32 to vector<64x128xf32>
    %10 = arith.maximumf %8, %9 : vector<64x128xf32>
    %11 = arith.truncf %10 : vector<64x128xf32> to vector<64x128xbf16>
    %c0_8 = arith.constant 0 : index
    %c0_9 = arith.constant 0 : index
    %c0_10 = arith.constant 0 : index
    %12 = vector.load %arg4[%c0_8, %c0_9, %c0_10] : memref<2x128x128xbf16, #tpu.memory_space<vmem>>, vector<1x128x128xbf16>
    %13 = vector.shape_cast %12 : vector<1x128x128xbf16> to vector<128x128xbf16>
    %cst_11 = arith.constant dense<0.000000e+00> : vector<64x128xf32>
    %14 = tpu.matmul %11, %13, %cst_11 {dimension_numbers = #tpu.dot_dimension_numbers<[1], [0], [0], [1], [0, 0, 1, 1], [], []>} : vector<64x128xbf16>, vector<128x128xbf16>, vector<64x128xf32> -> vector<64x128xf32>
    %c0_12 = arith.constant 0 : index
    %c0_13 = arith.constant 0 : index
    %c0_14 = arith.constant 0 : index
    %15 = vector.load %arg5[%c0_12, %c0_13, %c0_14] : memref<2x1x128xf32, #tpu.memory_space<vmem>>, vector<1x1x128xf32>
    %16 = vector.shape_cast %15 : vector<1x1x128xf32> to vector<1x128xf32>
    %17 = vector.broadcast %16 : vector<1x128xf32> to vector<64x128xf32>
    %18 = arith.addf %14, %17 : vector<64x128xf32>
    %19 = arith.addf %18, %0 : vector<64x128xf32>
    %cst_15 = arith.constant 0.000000e+00 : f32
    %20 = vector.broadcast %cst_15 : f32 to vector<64x128xf32>
    %21 = arith.maximumf %19, %20 : vector<64x128xf32>
    %22 = arith.truncf %21 : vector<64x128xf32> to vector<64x128xbf16>
    %c1 = arith.constant 1 : index
    %c0_16 = arith.constant 0 : index
    %c0_17 = arith.constant 0 : index
    %23 = vector.load %arg2[%c1, %c0_16, %c0_17] : memref<2x128x128xbf16, #tpu.memory_space<vmem>>, vector<1x128x128xbf16>
    %24 = vector.shape_cast %23 : vector<1x128x128xbf16> to vector<128x128xbf16>
    %cst_18 = arith.constant dense<0.000000e+00> : vector<64x128xf32>
    %25 = tpu.matmul %22, %24, %cst_18 {dimension_numbers = #tpu.dot_dimension_numbers<[1], [0], [0], [1], [0, 0, 1, 1], [], []>} : vector<64x128xbf16>, vector<128x128xbf16>, vector<64x128xf32> -> vector<64x128xf32>
    %c1_19 = arith.constant 1 : index
    %c0_20 = arith.constant 0 : index
    %c0_21 = arith.constant 0 : index
    %26 = vector.load %arg3[%c1_19, %c0_20, %c0_21] : memref<2x1x128xf32, #tpu.memory_space<vmem>>, vector<1x1x128xf32>
    %27 = vector.shape_cast %26 : vector<1x1x128xf32> to vector<1x128xf32>
    %28 = vector.broadcast %27 : vector<1x128xf32> to vector<64x128xf32>
    %29 = arith.addf %25, %28 : vector<64x128xf32>
    %cst_22 = arith.constant 0.000000e+00 : f32
    %30 = vector.broadcast %cst_22 : f32 to vector<64x128xf32>
    %31 = arith.maximumf %29, %30 : vector<64x128xf32>
    %32 = arith.truncf %31 : vector<64x128xf32> to vector<64x128xbf16>
    %c1_23 = arith.constant 1 : index
    %c0_24 = arith.constant 0 : index
    %c0_25 = arith.constant 0 : index
    %33 = vector.load %arg4[%c1_23, %c0_24, %c0_25] : memref<2x128x128xbf16, #tpu.memory_space<vmem>>, vector<1x128x128xbf16>
    %34 = vector.shape_cast %33 : vector<1x128x128xbf16> to vector<128x128xbf16>
    %cst_26 = arith.constant dense<0.000000e+00> : vector<64x128xf32>
    %35 = tpu.matmul %32, %34, %cst_26 {dimension_numbers = #tpu.dot_dimension_numbers<[1], [0], [0], [1], [0, 0, 1, 1], [], []>} : vector<64x128xbf16>, vector<128x128xbf16>, vector<64x128xf32> -> vector<64x128xf32>
    %c1_27 = arith.constant 1 : index
    %c0_28 = arith.constant 0 : index
    %c0_29 = arith.constant 0 : index
    %36 = vector.load %arg5[%c1_27, %c0_28, %c0_29] : memref<2x1x128xf32, #tpu.memory_space<vmem>>, vector<1x1x128xf32>
    %37 = vector.shape_cast %36 : vector<1x1x128xf32> to vector<1x128xf32>
    %38 = vector.broadcast %37 : vector<1x128xf32> to vector<64x128xf32>
    %39 = arith.addf %35, %38 : vector<64x128xf32>
    %40 = arith.addf %39, %21 : vector<64x128xf32>
    %cst_30 = arith.constant 0.000000e+00 : f32
    %41 = vector.broadcast %cst_30 : f32 to vector<64x128xf32>
    %42 = arith.maximumf %40, %41 : vector<64x128xf32>
    %43 = arith.truncf %42 : vector<64x128xf32> to vector<64x128xbf16>
    %c0_31 = arith.constant 0 : index
    %c0_32 = arith.constant 0 : index
    %44 = vector.load %arg6[%c0_31, %c0_32] : memref<128x128xbf16, #tpu.memory_space<vmem>>, vector<128x128xbf16>
    %cst_33 = arith.constant dense<0.000000e+00> : vector<64x128xf32>
    %45 = tpu.matmul %43, %44, %cst_33 {dimension_numbers = #tpu.dot_dimension_numbers<[1], [0], [0], [1], [0, 0, 1, 1], [], []>} : vector<64x128xbf16>, vector<128x128xbf16>, vector<64x128xf32> -> vector<64x128xf32>
    %c0_34 = arith.constant 0 : index
    %c0_35 = arith.constant 0 : index
    %46 = vector.load %arg7[%c0_34, %c0_35] : memref<1x128xf32, #tpu.memory_space<vmem>>, vector<1x128xf32>
    %47 = vector.broadcast %46 : vector<1x128xf32> to vector<64x128xf32>
    %48 = arith.addf %45, %47 : vector<64x128xf32>
    %cst_36 = arith.constant 0.000000e+00 : f32
    %49 = vector.broadcast %cst_36 : f32 to vector<64x128xf32>
    %50 = arith.maximumf %48, %49 : vector<64x128xf32>
    %51 = arith.truncf %50 : vector<64x128xf32> to vector<64x128xbf16>
    %c0_37 = arith.constant 0 : index
    %c0_38 = arith.constant 0 : index
    %52 = vector.load %arg8[%c0_37, %c0_38] : memref<128x128xbf16, #tpu.memory_space<vmem>>, vector<128x128xbf16>
    %cst_39 = arith.constant dense<0.000000e+00> : vector<64x128xf32>
    %53 = tpu.matmul %51, %52, %cst_39 {dimension_numbers = #tpu.dot_dimension_numbers<[1], [0], [0], [1], [0, 0, 1, 1], [], []>} : vector<64x128xbf16>, vector<128x128xbf16>, vector<64x128xf32> -> vector<64x128xf32>
    %c0_40 = arith.constant 0 : index
    %c0_41 = arith.constant 0 : index
    %54 = vector.load %arg9[%c0_40, %c0_41] : memref<1x128xf32, #tpu.memory_space<vmem>>, vector<1x128xf32>
    %55 = vector.broadcast %54 : vector<1x128xf32> to vector<64x128xf32>
    %56 = arith.addf %53, %55 : vector<64x128xf32>
    %57 = arith.truncf %56 : vector<64x128xf32> to vector<64x128xbf16>
    %c0_42 = arith.constant 0 : index
    %c0_43 = arith.constant 0 : index
    %58 = vector.load %arg10[%c0_42, %c0_43] : memref<64x128xbf16, #tpu.memory_space<vmem>>, vector<64x128xbf16>
    tpu.vector_store %arg10[%c0_42, %c0_43], %57 {strides = array<i32>} : memref<64x128xbf16, #tpu.memory_space<vmem>>, vector<64x128xbf16>,
    return
  }
  func.func @transform_0(%arg0: i32) -> (i32, i32) {
    %c0_i32 = arith.constant 0 : i32
    %c0_i32_0 = arith.constant 0 : i32
    return %arg0, %c0_i32 : i32, i32
  }
  func.func @transform_1(%arg0: i32) -> (i32, i32, i32) {
    %c0_i32 = arith.constant 0 : i32
    %c0_i32_0 = arith.constant 0 : i32
    %c0_i32_1 = arith.constant 0 : i32
    %c0_i32_2 = arith.constant 0 : i32
    return %c0_i32, %c0_i32_0, %c0_i32_1 : i32, i32, i32
  }
  func.func @transform_2(%arg0: i32) -> (i32, i32, i32) {
    %c0_i32 = arith.constant 0 : i32
    %c0_i32_0 = arith.constant 0 : i32
    %c0_i32_1 = arith.constant 0 : i32
    %c0_i32_2 = arith.constant 0 : i32
    return %c0_i32, %c0_i32_0, %c0_i32_1 : i32, i32, i32
  }
  func.func @transform_3(%arg0: i32) -> (i32, i32, i32) {
    %c0_i32 = arith.constant 0 : i32
    %c0_i32_0 = arith.constant 0 : i32
    %c0_i32_1 = arith.constant 0 : i32
    %c0_i32_2 = arith.constant 0 : i32
    return %c0_i32, %c0_i32_0, %c0_i32_1 : i32, i32, i32
  }
  func.func @transform_4(%arg0: i32) -> (i32, i32, i32) {
    %c0_i32 = arith.constant 0 : i32
    %c0_i32_0 = arith.constant 0 : i32
    %c0_i32_1 = arith.constant 0 : i32
    %c0_i32_2 = arith.constant 0 : i32
    return %c0_i32, %c0_i32_0, %c0_i32_1 : i32, i32, i32
  }
  func.func @transform_5(%arg0: i32) -> (i32, i32) {
    %c0_i32 = arith.constant 0 : i32
    %c0_i32_0 = arith.constant 0 : i32
    %c0_i32_1 = arith.constant 0 : i32
    return %c0_i32, %c0_i32_0 : i32, i32
  }
  func.func @transform_6(%arg0: i32) -> (i32, i32) {
    %c0_i32 = arith.constant 0 : i32
    %c0_i32_0 = arith.constant 0 : i32
    %c0_i32_1 = arith.constant 0 : i32
    return %c0_i32, %c0_i32_0 : i32, i32
  }
  func.func @transform_7(%arg0: i32) -> (i32, i32) {
    %c0_i32 = arith.constant 0 : i32
    %c0_i32_0 = arith.constant 0 : i32
    %c0_i32_1 = arith.constant 0 : i32
    return %c0_i32, %c0_i32_0 : i32, i32
  }
  func.func @transform_8(%arg0: i32) -> (i32, i32) {
    %c0_i32 = arith.constant 0 : i32
    %c0_i32_0 = arith.constant 0 : i32
    %c0_i32_1 = arith.constant 0 : i32
    return %c0_i32, %c0_i32_0 : i32, i32
  }
  func.func @transform_9(%arg0: i32) -> (i32, i32) {
    %c0_i32 = arith.constant 0 : i32
    %c0_i32_0 = arith.constant 0 : i32
    return %arg0, %c0_i32 : i32, i32
  }
}

</mosaic_0001>

<bundles_post_ra>
// kernel: _forward_impl.1
= control target key start
LH: loop header
LB: loop body
LE: loop exit
PB: predicated region body
PF: predicated region fallthrough
CT: control target
= control target key end

     0   :  { %14 = vsyncpa [#allocation3], 0  ;;  %s1091_s12 = smov [#allocation2]   ;;  %s1092_s14 = smov 64   ;;  %s1409_s0 = inlined_call_operand.vmem [shape: f32[64,128], index: 0, kind: input, shape index: {}]   ;;  %s1410_s1 = inlined_call_operand.vmem [shape: bf16[2,128,128], index: 1, kind: input, shape index: {}]   ;;  %s1411_s2 = inlined_call_operand.vmem [shape: f32[2,1,128], index: 2, kind: input, shape index: {}]   ;;  %s1412_s3 = inlined_call_operand.vmem [shape: bf16[2,128,128], index: 3, kind: input, shape index: {}]   ;;  %s1413_s4 = inlined_call_operand.vmem [shape: f32[2,1,128], index: 4, kind: input, shape index: {}]   ;;  %s1414_s5 = inlined_call_operand.vmem [shape: bf16[128,128], index: 5, kind: input, shape index: {}]   ;;  %s1415_s6 = inlined_call_operand.vmem [shape: f32[1,128], index: 6, kind: input, shape index: {}]   ;;  %s1416_s7 = inlined_call_operand.hbm [shape: bf16[128,128], index: 7, kind: input, shape index: {}]   ;;  %s1417_s8 = inlined_call_operand.vmem [shape: f32[1,128], index: 8, kind: input, shape index: {}]   ;;  %s1418_s9 = inlined_call_operand.vmem [shape: bf16[64,128], index: 9, kind: output, shape index: {}]  }
   0x1   :  { %s33_s11 = sshll.u32 %s1416_s7, 4  ;;  %s35_s13 = sshll.u32 %s1091_s12, 4  ;;  %s34_s11 = int_to_ptr.hbm [resolvable:$true] %s33_s11  ;;  %s36_s13 = int_to_ptr.vmem [resolvable:$true] %s35_s13 }
   0x2   :  { %s1093_s15 = smov 4  }
   0x3   :  { %41 = dma.hbm_to_vmem [thread:$0]  %s34_s11, 1024, %s36_s13, [#allocation3], %s1092_s14, %s1092_s14, %s1093_s15  }
   0x4   :  { %1089 = dma.done.wait [#allocation3], 1024  }
   0x5   :  { %1090 = vsyncadd [#allocation3], 4294966272  ;;  %v976_v0 = vld [vmem:[%s1410_s1 + $0x38] sm:$0xff]  ;;  %v975_v1 = vld [vmem:[%s1410_s1 + $0x30] sm:$0xff] }
   0x6   :  { %128 = vmatpush.bf16.msra.mxu0 %v976_v0  ;;  %1040 = vmatpush.bf16.msra.mxu2 %v976_v0  ;;  %v974_v2 = vld [vmem:[%s1410_s1 + $0x28] sm:$0xff]  ;;  %v973_v3 = vld [vmem:[%s1410_s1 + $0x20] sm:$0xff]  ;;  %v972_v4 = vld [vmem:[%s1410_s1 + $0x18] sm:$0xff] }
   0x7   :  { %v984_v5 = vld [vmem:[%s1412_s3 + $0x38] sm:$0xff]  ;;  %v971_v6 = vld [vmem:[%s1410_s1 + $0x10] sm:$0xff]  ;;  %v970_v8 = vld [vmem:[%s1410_s1 + $0x8] sm:$0xff] }
   0x8   :  { %237 = vmatpush.bf16.msra.mxu1 %v984_v5  ;;  %v983_v7 = vld [vmem:[%s1412_s3 + $0x30] sm:$0xff]  ;;  %1048 = vmatpush.bf16.msra.mxu3 %v984_v5  ;;  %v982_v9 = vld [vmem:[%s1412_s3 + $0x28] sm:$0xff]  ;;  %v969_v10 = vld [vmem:[%s1410_s1] sm:$0xff] }
   0x9   :  { %v1183_v11 = vld [vmem:[%s1409_s0] sm:$0xff]  ;;  %v1188_v12 = vld [vmem:[%s1409_s0 + $0x8] sm:$0xff]  ;;  %v1210_v18 = vld [vmem:[%s1409_s0 + $0x10] sm:$0xff] }
   0xa   :  { %129 = vmatpush.bf16.msra.mxu0 %v975_v1  ;;  %1041 = vmatpush.bf16.msra.mxu2 %v975_v1  ;;  %v1193_v13 = vld [vmem:[%s1409_s0 + $0x20] sm:$0xff]  ;;  %v1198_v14 = vld [vmem:[%s1409_s0 + $0x28] sm:$0xff]  ;;  %v56_v16 = vpack.c.bf16 %v1188_v12, %v1183_v11  ;;  %v1215_v19 = vld [vmem:[%s1409_s0 + $0x18] sm:$0xff] }
   0xb   :  { %v981_v15 = vld [vmem:[%s1412_s3 + $0x20] sm:$0xff]  ;;  %v58_v17 = vpack.c.bf16 %v1198_v14, %v1193_v13  ;;  %v1220_v20 = vld [vmem:[%s1409_s0 + $0x30] sm:$0xff]  ;;  %v1225_v21 = vld [vmem:[%s1409_s0 + $0x38] sm:$0xff]  ;;  %v57_v22 = vpack.c.bf16 %v1215_v19, %v1210_v18 }
   0xc   :  { %238 = vmatpush.bf16.msra.mxu1 %v983_v7  ;;  %1049 = vmatpush.bf16.msra.mxu3 %v983_v7  ;;  %v59_v23 = vpack.c.bf16 %v1225_v21, %v1220_v20  ;;  %v980_v24 = vld [vmem:[%s1412_s3 + $0x18] sm:$0xff]  ;;  %v979_v25 = vld [vmem:[%s1412_s3 + $0x10] sm:$0xff]  ;;  %v978_v26 = vld [vmem:[%s1412_s3 + $0x8] sm:$0xff] }
   0xd   :  { %v977_v27 = vld [vmem:[%s1412_s3] sm:$0xff]  ;;  %v992_v30 = vld [vmem:[%s1410_s1 + $0x78] sm:$0xff]  ;;  %v991_v33 = vld [vmem:[%s1410_s1 + $0x70] sm:$0xff] }
   0xe   :  { %130 = vmatpush.bf16.msra.mxu0 %v974_v2  ;;  %1042 = vmatpush.bf16.msra.mxu2 %v974_v2  ;;  %v1059_v29 = vld [vmem:[%s1411_s2] ss:$0 sm:$0xff]  ;;  %v990_v39 = vld [vmem:[%s1410_s1 + $0x68] sm:$0xff]  ;;  %v988_v61 = vld [vmem:[%s1410_s1 + $0x58] sm:$0xff] }
   0xf   :  { %v989_v44 = vld [vmem:[%s1410_s1 + $0x60] sm:$0xff]  ;;  %v987_v62 = vld [vmem:[%s1410_s1 + $0x50] sm:$0xff]  ;;  %v986_v63 = vld [vmem:[%s1410_s1 + $0x48] sm:$0xff] }
  0x10   :  { %239 = vmatpush.bf16.msra.mxu1 %v982_v9  ;;  %1050 = vmatpush.bf16.msra.mxu3 %v982_v9  ;;  %v985_v0 = vld [vmem:[%s1410_s1 + $0x40] sm:$0xff] }
  0x11   :  { %v1060_v2 = vld [vmem:[%s1413_s4] ss:$0 sm:$0xff] }
  0x12   :  { %131 = vmatpush.bf16.msra.mxu0 %v973_v3  ;;  %1043 = vmatpush.bf16.msra.mxu2 %v973_v3 }
  0x14   :  { %240 = vmatpush.bf16.msra.mxu1 %v981_v15  ;;  %1051 = vmatpush.bf16.msra.mxu3 %v981_v15 }
  0x16   :  { %132 = vmatpush.bf16.msra.mxu0 %v972_v4  ;;  %1044 = vmatpush.bf16.msra.mxu2 %v972_v4 }
  0x18   :  { %241 = vmatpush.bf16.msra.mxu1 %v980_v24  ;;  %1052 = vmatpush.bf16.msra.mxu3 %v980_v24 }
  0x1a   :  { %133 = vmatpush.bf16.msra.mxu0 %v971_v6  ;;  %1045 = vmatpush.bf16.msra.mxu2 %v971_v6 }
  0x1c   :  { %242 = vmatpush.bf16.msra.mxu1 %v979_v25  ;;  %1053 = vmatpush.bf16.msra.mxu3 %v979_v25 }
  0x1e   :  { %134 = vmatpush.bf16.msra.mxu0 %v970_v8  ;;  %1046 = vmatpush.bf16.msra.mxu2 %v970_v8 }
  0x20   :  { %243 = vmatpush.bf16.msra.mxu1 %v978_v26  ;;  %1054 = vmatpush.bf16.msra.mxu3 %v978_v26 }
  0x22   :  { %135 = vmatpush.bf16.msra.mxu0 %v969_v10  ;;  %1047 = vmatpush.bf16.msra.mxu2 %v969_v10 }
  0x24   :  { %244 = vmatpush.bf16.msra.mxu1 %v977_v27  ;;  %1055 = vmatpush.bf16.msra.mxu3 %v977_v27 }
  0x25   :  { %136 = vmatmul.bf16.vlgmr.msra.gmra.mxu0 %v56_v16  ;;  %146 = vmatmul.bf16.vlgmr.msra.gmra.mxu2 %v58_v17 }
  0x26   :  { %356 = vmatpush.bf16.msrb.mxu2 %v992_v30 }
  0x2a   :  { %357 = vmatpush.bf16.msrb.mxu2 %v991_v33  ;;  %v998_v33 = vld [vmem:[%s1412_s3 + $0x68] sm:$0xff] }
  0x2e   :  { %358 = vmatpush.bf16.msrb.mxu2 %v990_v39 }
  0x32   :  { %359 = vmatpush.bf16.msrb.mxu2 %v989_v44 }
  0x35   :  { %141 = vmatmul.bf16.gmra.mxu0 %v57_v22  ;;  %151 = vmatmul.bf16.gmra.mxu2 %v59_v23 }
  0x36   :  { %360 = vmatpush.bf16.msrb.mxu2 %v988_v61  ;;  %v1008_v61 = vld [vmem:[%s1414_s5 + $0x38] sm:$0xff] }
  0x37   :  { %584 = vmatpush.bf16.msrb.mxu0 %v1008_v61 }
  0x3a   :  { %361 = vmatpush.bf16.msrb.mxu2 %v987_v62 }
  0x3e   :  { %362 = vmatpush.bf16.msrb.mxu2 %v986_v63  ;;  %v1007_v63 = vld [vmem:[%s1414_s5 + $0x30] sm:$0xff] }
  0x3f   :  { %585 = vmatpush.bf16.msrb.mxu0 %v1007_v63 }
  0x42   :  { %363 = vmatpush.bf16.msrb.mxu2 %v985_v0  ;;  %v1006_v0 = vld [vmem:[%s1414_s5 + $0x28] sm:$0xff] }
  0x43   :  { %586 = vmatpush.bf16.msrb.mxu0 %v1006_v0 }
  0xa2   :  { %v137_v28 = vpop.f32.mrf.mxu0 }
  0xa3   :  { %v138_v32 = vadd.f32 %v1059_v29, %v137_v28 }
  0xa5   :  { %v157_v36 = vmax.f32 %v138_v32, 0.0 }
  0xa8   :  { %v147_v31 = vpop.f32.mrf.mxu2 }
  0xa9   :  { %v148_v38 = vadd.f32 %v1059_v29, %v147_v31 }
  0xaa   :  { %v139_v34 = vpop.f32.mrf.mxu0 }
  0xab   :  { %v140_v35 = vadd.f32 %v1059_v29, %v139_v34  ;;  %v161_v42 = vmax.f32 %v148_v38, 0.0 }
  0xad   :  { %v158_v37 = vmax.f32 %v140_v35, 0.0 }
  0xaf   :  { %v165_v40 = vpack.c.bf16 %v158_v37, %v157_v36  ;;  %v997_v36 = vld [vmem:[%s1412_s3 + $0x60] sm:$0xff] }
  0xb0   :  { %v149_v41 = vpop.f32.mrf.mxu2 }
  0xb1   :  { %245 = vmatmul.bf16.vlgmr.msra.gmra.mxu1 %v165_v40  ;;  %v150_v43 = vadd.f32 %v1059_v29, %v149_v41 }
  0xb2   :  { %v142_v45 = vpop.f32.mrf.mxu0 }
  0xb3   :  { %v162_v46 = vmax.f32 %v150_v43, 0.0  ;;  %v143_v49 = vadd.f32 %v1059_v29, %v142_v45  ;;  %v995_v45 = vld [vmem:[%s1412_s3 + $0x50] sm:$0xff] }
  0xb5   :  { %v167_v47 = vpack.c.bf16 %v162_v46, %v161_v42  ;;  %v159_v52 = vmax.f32 %v143_v49, 0.0 }
  0xb7   :  { %255 = vmatmul.bf16.vlgmr.msra.gmra.mxu3 %v167_v47  ;;  %v1061_v47 = vld [vmem:[%s1411_s2 + $0x1] ss:$0 sm:$0xff] }
  0xb8   :  { %v152_v48 = vpop.f32.mrf.mxu2 }
  0xb9   :  { %v153_v54 = vadd.f32 %v1059_v29, %v152_v48 }
  0xba   :  { %v144_v50 = vpop.f32.mrf.mxu0 }
  0xbb   :  { %v145_v51 = vadd.f32 %v1059_v29, %v144_v50  ;;  %v163_v57 = vmax.f32 %v153_v54, 0.0 }
  0xbd   :  { %v160_v53 = vmax.f32 %v145_v51, 0.0 }
  0xbf   :  { %v166_v55 = vpack.c.bf16 %v160_v53, %v159_v52 }
  0xc0   :  { %v154_v56 = vpop.f32.mrf.mxu2 }
  0xc1   :  { %250 = vmatmul.bf16.gmra.mxu1 %v166_v55  ;;  %v155_v58 = vadd.f32 %v1059_v29, %v154_v56 }
  0xc3   :  { %v164_v59 = vmax.f32 %v155_v58, 0.0 }
  0xc5   :  { %v168_v60 = vpack.c.bf16 %v164_v59, %v163_v57 }
  0xc7   :  { %260 = vmatmul.bf16.gmra.mxu3 %v168_v60 }
 0x12e   :  { %v246_v1 = vpop.f32.mrf.mxu1 }
 0x12f   :  { %v247_v3 = vadd.f32 %v1060_v2, %v246_v1 }
 0x131   :  { %v1274_v5 = vadd.f32 %v247_v3, %v1183_v11 }
 0x133   :  { %v274_v8 = vmax.f32 %v1274_v5, 0.0 }
 0x136   :  { %v248_v4 = vpop.f32.mrf.mxu1 }
 0x137   :  { %v249_v6 = vadd.f32 %v1060_v2, %v248_v4  ;;  %v1005_v4 = vld [vmem:[%s1414_s5 + $0x20] sm:$0xff] }
 0x138   :  { %587 = vmatpush.bf16.msrb.mxu0 %v1005_v4 }
 0x139   :  { %v1277_v7 = vadd.f32 %v249_v6, %v1188_v12 }
 0x13a   :  { %v256_v16 = vpop.f32.mrf.mxu3 }
 0x13b   :  { %v275_v9 = vmax.f32 %v1277_v7, 0.0  ;;  %v257_v28 = vadd.f32 %v1060_v2, %v256_v16  ;;  %v1016_v7 = vld [vmem:[#allocation2 + $0x38] sm:$0xff] }
 0x13c   :  { %693 = vmatpush.bf16.msrb.mxu1 %v1016_v7 }
 0x13d   :  { %v282_v10 = vpack.c.bf16 %v275_v9, %v274_v8  ;;  %v1304_v31 = vadd.f32 %v257_v28, %v1193_v13  ;;  %v1004_v28 = vld [vmem:[%s1414_s5 + $0x18] sm:$0xff] }
 0x13e   :  { %v251_v15 = vpop.f32.mrf.mxu1  ;;  %588 = vmatpush.bf16.msrb.mxu0 %v1004_v28 }
 0x13f   :  { %364 = vmatmul.bf16.vlgmr.msrb.gmra.mxu2 %v282_v10  ;;  %v252_v17 = vadd.f32 %v1060_v2, %v251_v15  ;;  %v278_v34 = vmax.f32 %v1304_v31, 0.0 }
 0x141   :  { %v1286_v11 = vadd.f32 %v252_v17, %v1210_v18  ;;  %v1000_v18 = vld [vmem:[%s1412_s3 + $0x78] sm:$0xff] }
 0x142   :  { %v258_v24 = vpop.f32.mrf.mxu3  ;;  %467 = vmatpush.bf16.msrb.mxu3 %v1000_v18 }
 0x143   :  { %v276_v25 = vmax.f32 %v1286_v11, 0.0  ;;  %v259_v29 = vadd.f32 %v1060_v2, %v258_v24 }
 0x145   :  { %v1307_v32 = vadd.f32 %v259_v29, %v1198_v14  ;;  %v996_v14 = vld [vmem:[%s1412_s3 + $0x58] sm:$0xff]  ;;  %v1003_v29 = vld [vmem:[%s1414_s5 + $0x10] sm:$0xff] }
 0x146   :  { %v253_v22 = vpop.f32.mrf.mxu1  ;;  %589 = vmatpush.bf16.msrb.mxu0 %v1003_v29 }
 0x147   :  { %v254_v23 = vadd.f32 %v1060_v2, %v253_v22  ;;  %v279_v35 = vmax.f32 %v1307_v32, 0.0 }
 0x149   :  { %v1289_v12 = vadd.f32 %v254_v23, %v1215_v19  ;;  %v999_v19 = vld [vmem:[%s1412_s3 + $0x70] sm:$0xff]  ;;  %v284_v13 = vpack.c.bf16 %v279_v35, %v278_v34 }
 0x14a   :  { %v261_v30 = vpop.f32.mrf.mxu3  ;;  %468 = vmatpush.bf16.msrb.mxu3 %v999_v19  ;;  %v1002_v19 = vld [vmem:[%s1414_s5 + $0x8] sm:$0xff] }
 0x14b   :  { %v277_v26 = vmax.f32 %v1289_v12, 0.0  ;;  %v262_v38 = vadd.f32 %v1060_v2, %v261_v30  ;;  %590 = vmatpush.bf16.msrb.mxu0 %v1002_v19  ;;  %v1001_v30 = vld [vmem:[%s1414_s5] sm:$0xff] }
 0x14d   :  { %v283_v27 = vpack.c.bf16 %v277_v26, %v276_v25  ;;  %v1325_v40 = vadd.f32 %v262_v38, %v1220_v20  ;;  %v994_v20 = vld [vmem:[%s1412_s3 + $0x48] sm:$0xff] }
 0x14e   :  { %469 = vmatpush.bf16.msrb.mxu3 %v998_v33 }
 0x14f   :  { %369 = vmatmul.bf16.gmra.mxu2 %v283_v27  ;;  %v280_v42 = vmax.f32 %v1325_v40, 0.0  ;;  %591 = vmatpush.bf16.msrb.mxu0 %v1001_v30  ;;  %v1063_v40 = vld [vmem:[%s1415_s6] ss:$0 sm:$0xff] }
 0x152   :  { %470 = vmatpush.bf16.msrb.mxu3 %v997_v36  ;;  %v263_v37 = vpop.f32.mrf.mxu3  ;;  %v1062_v36 = vld [vmem:[%s1413_s4 + $0x1] ss:$0 sm:$0xff] }
 0x153   :  { %v264_v39 = vadd.f32 %v1060_v2, %v263_v37 }
 0x155   :  { %v1328_v41 = vadd.f32 %v264_v39, %v1225_v21  ;;  %v993_v21 = vld [vmem:[%s1412_s3 + $0x40] sm:$0xff] }
 0x156   :  { %471 = vmatpush.bf16.msrb.mxu3 %v996_v14 }
 0x157   :  { %v281_v43 = vmax.f32 %v1328_v41, 0.0 }
 0x159   :  { %v285_v44 = vpack.c.bf16 %v281_v43, %v280_v42 }
 0x15a   :  { %472 = vmatpush.bf16.msrb.mxu3 %v995_v45 }
 0x15e   :  { %473 = vmatpush.bf16.msrb.mxu3 %v994_v20 }
 0x15f   :  { %374 = vmatmul.bf16.gmra.mxu2 %v284_v13 }
 0x162   :  { %474 = vmatpush.bf16.msrb.mxu3 %v993_v21 }
 0x16f   :  { %379 = vmatmul.bf16.gmra.mxu2 %v285_v44 }
 0x1c2   :  { %v365_v46 = vpop.f32.mrf.mxu2 }
 0x1c3   :  { %v366_v48 = vadd.f32 %v1061_v47, %v365_v46 }
 0x1c5   :  { %v385_v51 = vmax.f32 %v366_v48, 0.0 }
 0x1ca   :  { %v367_v49 = vpop.f32.mrf.mxu2 }
 0x1cb   :  { %v368_v50 = vadd.f32 %v1061_v47, %v367_v49 }
 0x1cd   :  { %v386_v52 = vmax.f32 %v368_v50, 0.0 }
 0x1cf   :  { %v393_v53 = vpack.c.bf16 %v386_v52, %v385_v51 }
 0x1d1   :  { %475 = vmatmul.bf16.vlgmr.msrb.gmra.mxu3 %v393_v53 }
 0x1d2   :  { %v370_v54 = vpop.f32.mrf.mxu2 }
 0x1d3   :  { %v371_v55 = vadd.f32 %v1061_v47, %v370_v54  ;;  %v1014_v54 = vld [vmem:[#allocation2 + $0x28] sm:$0xff] }
 0x1d5   :  { %v387_v58 = vmax.f32 %v371_v55, 0.0 }
 0x1da   :  { %v372_v56 = vpop.f32.mrf.mxu2 }
 0x1db   :  { %v373_v57 = vadd.f32 %v1061_v47, %v372_v56 }
 0x1dd   :  { %v388_v59 = vmax.f32 %v373_v57, 0.0 }
 0x1df   :  { %v394_v60 = vpack.c.bf16 %v388_v59, %v387_v58  ;;  %v1012_v59 = vld [vmem:[#allocation2 + $0x18] sm:$0xff] }
 0x1e1   :  { %480 = vmatmul.bf16.gmra.mxu3 %v394_v60 }
 0x1e2   :  { %v375_v62 = vpop.f32.mrf.mxu2 }
 0x1e3   :  { %v376_v1 = vadd.f32 %v1061_v47, %v375_v62 }
 0x1e5   :  { %v389_v6 = vmax.f32 %v376_v1, 0.0  ;;  %v1011_v1 = vld [vmem:[#allocation2 + $0x10] sm:$0xff] }
 0x1ea   :  { %v377_v2 = vpop.f32.mrf.mxu2 }
 0x1eb   :  { %v378_v3 = vadd.f32 %v1061_v47, %v377_v2  ;;  %v1010_v2 = vld [vmem:[#allocation2 + $0x8] sm:$0xff] }
 0x1ed   :  { %v390_v10 = vmax.f32 %v378_v3, 0.0  ;;  %v1009_v3 = vld [vmem:[#allocation2] sm:$0xff] }
 0x1ef   :  { %v395_v15 = vpack.c.bf16 %v390_v10, %v389_v6 }
 0x1f1   :  { %485 = vmatmul.bf16.gmra.mxu3 %v395_v15 }
 0x1f2   :  { %v380_v16 = vpop.f32.mrf.mxu2 }
 0x1f3   :  { %v381_v17 = vadd.f32 %v1061_v47, %v380_v16 }
 0x1f5   :  { %v391_v24 = vmax.f32 %v381_v17, 0.0 }
 0x1fa   :  { %v382_v22 = vpop.f32.mrf.mxu2 }
 0x1fb   :  { %v383_v23 = vadd.f32 %v1061_v47, %v382_v22 }
 0x1fd   :  { %v392_v27 = vmax.f32 %v383_v23, 0.0 }
 0x1ff   :  { %v396_v18 = vpack.c.bf16 %v392_v27, %v391_v24 }
 0x201   :  { %490 = vmatmul.bf16.gmra.mxu3 %v396_v18 }
 0x254   :  { %v476_v33 = vpop.f32.mrf.mxu3 }
 0x255   :  { %v477_v13 = vadd.f32 %v1062_v36, %v476_v33 }
 0x257   :  { %v496_v37 = vadd.f32 %v477_v13, %v274_v8 }
 0x259   :  { %v504_v44 = vmax.f32 %v496_v37, 0.0 }
 0x25c   :  { %v478_v14 = vpop.f32.mrf.mxu3 }
 0x25d   :  { %v479_v38 = vadd.f32 %v1062_v36, %v478_v14 }
 0x25f   :  { %v497_v39 = vadd.f32 %v479_v38, %v275_v9  ;;  %v1015_v9 = vld [vmem:[#allocation2 + $0x30] sm:$0xff] }
 0x260   :  { %694 = vmatpush.bf16.msrb.mxu1 %v1015_v9 }
 0x261   :  { %v505_v45 = vmax.f32 %v497_v39, 0.0 }
 0x263   :  { %v512_v20 = vpack.c.bf16 %v505_v45, %v504_v44 }
 0x264   :  { %v481_v21 = vpop.f32.mrf.mxu3  ;;  %695 = vmatpush.bf16.msrb.mxu1 %v1014_v54 }
 0x265   :  { %592 = vmatmul.bf16.vlgmr.msrb.gmra.mxu0 %v512_v20  ;;  %v482_v46 = vadd.f32 %v1062_v36, %v481_v21 }
 0x267   :  { %v498_v48 = vadd.f32 %v482_v46, %v276_v25  ;;  %v1064_v46 = vld [vmem:[%s1417_s8] ss:$0 sm:$0xff] }
 0x269   :  { %v506_v5 = vmax.f32 %v498_v48, 0.0 }
 0x26c   :  { %v483_v47 = vpop.f32.mrf.mxu3 }
 0x26d   :  { %v484_v49 = vadd.f32 %v1062_v36, %v483_v47 }
 0x26f   :  { %v499_v50 = vadd.f32 %v484_v49, %v277_v26  ;;  %v1013_v26 = vld [vmem:[#allocation2 + $0x20] sm:$0xff] }
 0x270   :  { %696 = vmatpush.bf16.msrb.mxu1 %v1013_v26 }
 0x271   :  { %v507_v8 = vmax.f32 %v499_v50, 0.0 }
 0x273   :  { %v513_v51 = vpack.c.bf16 %v507_v8, %v506_v5 }
 0x274   :  { %v486_v52 = vpop.f32.mrf.mxu3  ;;  %697 = vmatpush.bf16.msrb.mxu1 %v1012_v59 }
 0x275   :  { %597 = vmatmul.bf16.gmra.mxu0 %v513_v51  ;;  %v487_v53 = vadd.f32 %v1062_v36, %v486_v52 }
 0x277   :  { %v500_v11 = vadd.f32 %v487_v53, %v278_v34 }
 0x278   :  { %698 = vmatpush.bf16.msrb.mxu1 %v1011_v1 }
 0x279   :  { %v508_v56 = vmax.f32 %v500_v11, 0.0 }
 0x27c   :  { %v488_v55 = vpop.f32.mrf.mxu3  ;;  %699 = vmatpush.bf16.msrb.mxu1 %v1010_v2 }
 0x27d   :  { %v489_v25 = vadd.f32 %v1062_v36, %v488_v55 }
 0x27f   :  { %v501_v12 = vadd.f32 %v489_v25, %v279_v35 }
 0x280   :  { %700 = vmatpush.bf16.msrb.mxu1 %v1009_v3 }
 0x281   :  { %v509_v57 = vmax.f32 %v501_v12, 0.0 }
 0x283   :  { %v514_v58 = vpack.c.bf16 %v509_v57, %v508_v56 }
 0x284   :  { %v491_v60 = vpop.f32.mrf.mxu3 }
 0x285   :  { %602 = vmatmul.bf16.gmra.mxu0 %v514_v58  ;;  %v492_v61 = vadd.f32 %v1062_v36, %v491_v60 }
 0x287   :  { %v502_v31 = vadd.f32 %v492_v61, %v280_v42 }
 0x289   :  { %v510_v35 = vmax.f32 %v502_v31, 0.0 }
 0x28c   :  { %v493_v62 = vpop.f32.mrf.mxu3 }
 0x28d   :  { %v494_v34 = vadd.f32 %v1062_v36, %v493_v62 }
 0x28f   :  { %v503_v32 = vadd.f32 %v494_v34, %v281_v43 }
 0x291   :  { %v511_v63 = vmax.f32 %v503_v32, 0.0 }
 0x293   :  { %v515_v0 = vpack.c.bf16 %v511_v63, %v510_v35 }
 0x295   :  { %607 = vmatmul.bf16.gmra.mxu0 %v515_v0 }
 0x2e2   :  { %v593_v4 = vpop.f32.mrf.mxu0 }
 0x2e3   :  { %v594_v42 = vadd.f32 %v1063_v40, %v593_v4 }
 0x2e5   :  { %v613_v41 = vmax.f32 %v594_v42, 0.0 }
 0x2ea   :  { %v595_v6 = vpop.f32.mrf.mxu0 }
 0x2eb   :  { %v596_v10 = vadd.f32 %v1063_v40, %v595_v6 }
 0x2ed   :  { %v614_v43 = vmax.f32 %v596_v10, 0.0 }
 0x2ef   :  { %v621_v15 = vpack.c.bf16 %v614_v43, %v613_v41 }
 0x2f1   :  { %701 = vmatmul.bf16.vlgmr.msrb.gmra.mxu1 %v621_v15 }
 0x2f2   :  { %v598_v16 = vpop.f32.mrf.mxu0 }
 0x2f3   :  { %v599_v17 = vadd.f32 %v1063_v40, %v598_v16 }
 0x2f5   :  { %v615_v24 = vmax.f32 %v599_v17, 0.0 }
 0x2fa   :  { %v600_v22 = vpop.f32.mrf.mxu0 }
 0x2fb   :  { %v601_v23 = vadd.f32 %v1063_v40, %v600_v22 }
 0x2fd   :  { %v616_v27 = vmax.f32 %v601_v23, 0.0 }
 0x2ff   :  { %v622_v18 = vpack.c.bf16 %v616_v27, %v615_v24 }
 0x301   :  { %706 = vmatmul.bf16.gmra.mxu1 %v622_v18 }
 0x302   :  { %v603_v28 = vpop.f32.mrf.mxu0 }
 0x303   :  { %v604_v29 = vadd.f32 %v1063_v40, %v603_v28 }
 0x305   :  { %v617_v33 = vmax.f32 %v604_v29, 0.0 }
 0x30a   :  { %v605_v19 = vpop.f32.mrf.mxu0 }
 0x30b   :  { %v606_v30 = vadd.f32 %v1063_v40, %v605_v19 }
 0x30d   :  { %v618_v36 = vmax.f32 %v606_v30, 0.0 }
 0x30f   :  { %v623_v13 = vpack.c.bf16 %v618_v36, %v617_v33 }
 0x311   :  { %711 = vmatmul.bf16.gmra.mxu1 %v623_v13 }
 0x312   :  { %v608_v14 = vpop.f32.mrf.mxu0 }
 0x313   :  { %v609_v37 = vadd.f32 %v1063_v40, %v608_v14 }
 0x315   :  { %v619_v44 = vmax.f32 %v609_v37, 0.0 }
 0x31a   :  { %v610_v38 = vpop.f32.mrf.mxu0 }
 0x31b   :  { %v611_v39 = vadd.f32 %v1063_v40, %v610_v38 }
 0x31d   :  { %v620_v45 = vmax.f32 %v611_v39, 0.0 }
 0x31f   :  { %v624_v20 = vpack.c.bf16 %v620_v45, %v619_v44 }
 0x321   :  { %716 = vmatmul.bf16.gmra.mxu1 %v624_v20 }
 0x36e   :  { %v702_v21 = vpop.f32.mrf.mxu1 }
 0x36f   :  { %v703_v48 = vadd.f32 %v1064_v46, %v702_v21 }
 0x376   :  { %v704_v47 = vpop.f32.mrf.mxu1 }
 0x377   :  { %v705_v49 = vadd.f32 %v1064_v46, %v704_v47 }
 0x379   :  { %v1020_v50 = vpack.c.bf16 %v705_v49, %v703_v48 }
 0x37b   :  { %1021 = vst [vmem:[%s1418_s9] sm:$0xff] %v1020_v50  }
 0x37e   :  { %v707_v5 = vpop.f32.mrf.mxu1 }
 0x37f   :  { %v708_v51 = vadd.f32 %v1064_v46, %v707_v5 }
 0x386   :  { %v709_v8 = vpop.f32.mrf.mxu1 }
 0x387   :  { %v710_v52 = vadd.f32 %v1064_v46, %v709_v8 }
 0x389   :  { %v1025_v7 = vpack.c.bf16 %v710_v52, %v708_v51 }
 0x38b   :  { %1037 = vst [vmem:[%s1418_s9 + $0x8] sm:$0xff] %v1025_v7  }
 0x38e   :  { %v712_v9 = vpop.f32.mrf.mxu1 }
 0x38f   :  { %v713_v54 = vadd.f32 %v1064_v46, %v712_v9 }
 0x396   :  { %v714_v53 = vpop.f32.mrf.mxu1 }
 0x397   :  { %v715_v55 = vadd.f32 %v1064_v46, %v714_v53 }
 0x399   :  { %v1030_v11 = vpack.c.bf16 %v715_v55, %v713_v54 }
 0x39b   :  { %1038 = vst [vmem:[%s1418_s9 + $0x10] sm:$0xff] %v1030_v11  }
 0x39e   :  { %v717_v25 = vpop.f32.mrf.mxu1 }
 0x39f   :  { %v718_v26 = vadd.f32 %v1064_v46, %v717_v25 }
 0x3a6   :  { %v719_v12 = vpop.f32.mrf.mxu1 }
 0x3a7   :  { %v720_v56 = vadd.f32 %v1064_v46, %v719_v12 }
 0x3a9   :  { %v1035_v57 = vpack.c.bf16 %v720_v56, %v718_v26 }
 0x3ab   :  { %1039 = vst [vmem:[%s1418_s9 + $0x18] sm:$0xff] %v1035_v57  }
 0x3ac   :  { %742 = vsyncpa [#allocation3], 1 }

</bundles_post_ra>
